<compile_context>
chip_gen: v7x
topology: tpu7x:2x2x1
jax: 0.10.0
libtpu: 0.0.40
codegen_flags: <defaults>
</compile_context>

<pallas_src>
import jax
import jax.numpy as jnp
import numpy as np
from jax.experimental import pallas as pl
from jax.experimental.pallas import tpu as pltpu

LANE = 128  # the single output column is padded to one full lane group for the MXU


def _binary_logistic_kernel(x_ref, w_ref, b_ref, out_ref):
    # x: (bm, D) f32, w: (D, 128) bf16 (only column 0 is real), b: (1, 128) f32
    x = x_ref[...].astype(jnp.bfloat16)                 # in-kernel cast (mem-bound => free)
    z = jnp.dot(x, w_ref[...], preferred_element_type=jnp.float32) + b_ref[...]
    p = pl.reciprocal(1.0 + jnp.exp(-z), approx=False)  # exact sigmoid in f32
    out_ref[...] = p[:, :1].astype(out_ref.dtype)       # store only the real column


def _pick_bm(batch, d, *, bm_max=512, vmem_budget_bytes=24 * 1024 * 1024):
    """Largest batch tile (<= bm_max) whose pipelined VMEM working set fits the
    budget, and not (much) larger than the batch itself."""
    # ~ per-step VMEM: 2 double-buffered (bm, D) f32 inputs + in-kernel bf16 copy
    #                  + 2 x (D, 128) bf16 weight buffers (+ small bias/output)
    weight_bytes = 2 * d * LANE * 2
    bm = bm_max
    while bm > 8 and (bm * d * (2 * 4 + 2) + weight_bytes) > vmem_budget_bytes:
        bm //= 2
    batch_rounded = ((batch + 7) // 8) * 8  # sublane multiple
    return max(8, min(bm, batch_rounded))


def pack_params(w, b, *, param_dtype=jnp.bfloat16):
    """Pad parameters ONCE at init time (not per forward call).

    w: (1, D) f32 PyTorch nn.Linear weight, b: (1,) f32 bias.
    Returns (w_pad: (D, 128) param_dtype, b_pad: (1, 128) f32).
    """
    d = w.shape[1]
    w_pad = jnp.zeros((d, LANE), param_dtype).at[:, 0].set(w[0].astype(param_dtype))
    b_pad = jnp.zeros((1, LANE), jnp.float32).at[:, 0].set(b.astype(jnp.float32)[0])
    return w_pad, b_pad


def binary_logistic_forward(x, w_pad, b_pad, *, bm=None):
    """x: (B, ...) f32; w_pad/b_pad from pack_params.  Returns (B, 1) probabilities."""
    batch = x.shape[0]
    xf = x.reshape(batch, -1)  # nn.Flatten — metadata-only on a contiguous array
    d = xf.shape[1]
    assert w_pad.shape == (d, LANE) and b_pad.shape == (1, LANE)
    if bm is None:
        bm = _pick_bm(batch, d)
    # TODO(synk): for very large D (>~32K on v7x's 64 MiB VMEM) add a K grid
    # axis with an f32 VMEM accumulator instead of a full-D input block.
    grid = (pl.cdiv(batch, bm),)  # ragged last block handled by Pallas (no jnp.pad)

    return pl.pallas_call(
        _binary_logistic_kernel,
        out_shape=jax.ShapeDtypeStruct((batch, 1), jnp.float32),
        grid=grid,
        in_specs=[
            pl.BlockSpec((bm, d), lambda i: (i, 0)),      # batch-tiled activation (f32)
            pl.BlockSpec((d, LANE), lambda i: (0, 0)),    # resident padded weight
            pl.BlockSpec((1, LANE), lambda i: (0, 0)),    # resident padded bias
        ],
        out_specs=pl.BlockSpec((bm, 1), lambda i: (i, 0)),  # narrow masked store
        compiler_params=pltpu.CompilerParams(
            dimension_semantics=("parallel",),
            vmem_limit_bytes=32 * 1024 * 1024,
        ),
    )(xf, w_pad, b_pad)


def init_params(key, d_in):
    """PyTorch nn.Linear(d_in, 1) default init: U(-1/sqrt(D), 1/sqrt(D))."""
    kw, kb = jax.random.split(key)
    bound = 1.0 / np.sqrt(d_in)
    w = jax.random.uniform(kw, (1, d_in), jnp.float32, -bound, bound)
    b = jax.random.uniform(kb, (1,), jnp.float32, -bound, bound)
    return w, b


def reference_forward(x, w, b, param_dtype=jnp.bfloat16):
    # Pure-JAX reference with the same bf16 quantization of x / W (f32 accumulate).
    # NOTE: vs. the true f32 PyTorch module the difference is bf16-level.
    xf = x.reshape(x.shape[0], -1).astype(param_dtype).astype(jnp.float32)
    wq = w.astype(param_dtype).astype(jnp.float32)
    logits = xf @ wq.T + b.reshape(1, 1)
    return 1.0 / (1.0 + jnp.exp(-logits))


if __name__ == "__main__":
    # Small config consistent with the module: input_shape=(4, 16, 16), batch=2.
    B, C, H, W = 2, 4, 16, 16
    D = C * H * W

    key = jax.random.PRNGKey(0)
    key, xk = jax.random.split(key)
    x = jax.random.normal(xk, (B, C, H, W), jnp.float32)
    w, b = init_params(key, D)
    w_pad, b_pad = pack_params(w, b)  # built once, reused across calls

    out = jax.block_until_ready(binary_logistic_forward(x, w_pad, b_pad))
    assert out.shape == (B, 1)
    ref = reference_forward(x, w, b)
    np.testing.assert_allclose(np.asarray(out), np.asarray(ref), rtol=1e-5, atol=1e-5)

    # Non-multiple batch with a small forced tile: multi-step "parallel" grid plus a
    # ragged trailing block (300 = 2*128 + 44), no wrapper-side padding of the input.
    key, xk2 = jax.random.split(key)
    x2 = jax.random.normal(xk2, (300, C, H, W), jnp.float32)
    out2 = jax.block_until_ready(binary_logistic_forward(x2, w_pad, b_pad, bm=128))
    assert out2.shape == (300, 1)
    ref2 = reference_forward(x2, w, b)
    np.testing.assert_allclose(np.asarray(out2), np.asarray(ref2), rtol=1e-5, atol=1e-5)

    # Default (VMEM-budget-sized) tile path on the same batch.
    out3 = jax.block_until_ready(binary_logistic_forward(x2, w_pad, b_pad))
    np.testing.assert_allclose(np.asarray(out3), np.asarray(ref2), rtol=1e-5, atol=1e-5)

    print("KERNEL_OK")
</pallas_src>

<mosaic_0001>
module attributes {stable_mosaic.version = 11 : i64} {
  func.func @_binary_logistic_kernel(%arg0: i32, %arg1: memref<8x1024xf32, #tpu.memory_space<vmem>>, %arg2: memref<1024x128xbf16, #tpu.memory_space<vmem>>, %arg3: memref<1x128xf32, #tpu.memory_space<vmem>>, %arg4: memref<8x1xf32, #tpu.memory_space<vmem>>) attributes {dimension_semantics = [#tpu.dimension_semantics<parallel>], iteration_bounds = array<i64: 1>, scalar_prefetch = 0 : i64, scratch_operands = 0 : i64, tpu.core_type = #tpu.core_type<tc>, window_params = [{transform_indices = @transform_0, window_bounds = array<i64: 8, 1024>}, {pipeline_mode = #tpu.pipeline_mode<synchronous>, transform_indices = @transform_1, window_bounds = array<i64: 1024, 128>}, {pipeline_mode = #tpu.pipeline_mode<synchronous>, transform_indices = @transform_2, window_bounds = array<i64: 1, 128>}, {transform_indices = @transform_3, window_bounds = array<i64: 8, 1>}]} {
    %c0 = arith.constant 0 : index
    %c0_0 = arith.constant 0 : index
    %0 = vector.load %arg1[%c0, %c0_0] : memref<8x1024xf32, #tpu.memory_space<vmem>>, vector<8x1024xf32>
    %1 = arith.truncf %0 : vector<8x1024xf32> to vector<8x1024xbf16>
    %c0_1 = arith.constant 0 : index
    %c0_2 = arith.constant 0 : index
    %2 = vector.load %arg2[%c0_1, %c0_2] : memref<1024x128xbf16, #tpu.memory_space<vmem>>, vector<1024x128xbf16>
    %cst = arith.constant dense<0.000000e+00> : vector<8x128xf32>
    %3 = tpu.matmul %1, %2, %cst {dimension_numbers = #tpu.dot_dimension_numbers<[1], [0], [0], [1], [0, 0, 1, 1], [], []>} : vector<8x1024xbf16>, vector<1024x128xbf16>, vector<8x128xf32> -> vector<8x128xf32>
    %c0_3 = arith.constant 0 : index
    %c0_4 = arith.constant 0 : index
    %4 = vector.load %arg3[%c0_3, %c0_4] : memref<1x128xf32, #tpu.memory_space<vmem>>, vector<1x128xf32>
    %5 = vector.broadcast %4 : vector<1x128xf32> to vector<8x128xf32>
    %6 = arith.addf %3, %5 : vector<8x128xf32>
    %cst_5 = arith.constant 0.000000e+00 : f32
    %7 = vector.broadcast %cst_5 : f32 to vector<8x128xf32>
    %8 = arith.subf %7, %6 : vector<8x128xf32>
    %9 = math.exp %8 : vector<8x128xf32>
    %cst_6 = arith.constant 1.000000e+00 : f32
    %10 = vector.broadcast %cst_6 : f32 to vector<8x128xf32>
    %11 = arith.addf %10, %9 : vector<8x128xf32>
    %12 = tpu.reciprocal %11 : vector<8x128xf32> -> vector<8x128xf32>
    %13 = vector.extract_strided_slice %12 {offsets = [0, 0], sizes = [8, 1], strides = [1, 1]} : vector<8x128xf32> to vector<8x1xf32>
    %c0_7 = arith.constant 0 : index
    %c0_8 = arith.constant 0 : index
    %14 = vector.load %arg4[%c0_7, %c0_8] : memref<8x1xf32, #tpu.memory_space<vmem>>, vector<8x1xf32>
    tpu.vector_store %arg4[%c0_7, %c0_8], %13 {strides = array<i32>} : memref<8x1xf32, #tpu.memory_space<vmem>>, vector<8x1xf32>,
    return
  }
  func.func @transform_0(%arg0: i32) -> (i32, i32) {
    %c0_i32 = arith.constant 0 : i32
    %c0_i32_0 = arith.constant 0 : i32
    return %arg0, %c0_i32 : i32, i32
  }
  func.func @transform_1(%arg0: i32) -> (i32, i32) {
    %c0_i32 = arith.constant 0 : i32
    %c0_i32_0 = arith.constant 0 : i32
    %c0_i32_1 = arith.constant 0 : i32
    return %c0_i32, %c0_i32_0 : i32, i32
  }
  func.func @transform_2(%arg0: i32) -> (i32, i32) {
    %c0_i32 = arith.constant 0 : i32
    %c0_i32_0 = arith.constant 0 : i32
    %c0_i32_1 = arith.constant 0 : i32
    return %c0_i32, %c0_i32_0 : i32, i32
  }
  func.func @transform_3(%arg0: i32) -> (i32, i32) {
    %c0_i32 = arith.constant 0 : i32
    %c0_i32_0 = arith.constant 0 : i32
    return %arg0, %c0_i32 : i32, i32
  }
}

</mosaic_0001>

<bundles_post_ra>
// kernel: tpu_custom_call.1
= control target key start
LH: loop header
LB: loop body
LE: loop exit
PB: predicated region body
PF: predicated region fallthrough
CT: control target
= control target key end

     0   :  { %8 = vsyncpa [#allocation3], 0  ;;  %s1229_s0 = inlined_call_operand.hbm [shape: f32[2,1024], index: 0, kind: input, shape index: {}]   ;;  %s1230_s1 = inlined_call_operand.hbm [shape: bf16[1024,128], index: 1, kind: input, shape index: {}]   ;;  %s1231_s2 = inlined_call_operand.vmem [shape: f32[1,128], index: 2, kind: input, shape index: {}]   ;;  %s1232_s3 = inlined_call_operand.vmem [shape: f32[2,1], index: 3, kind: output, shape index: {}]  }
   0x1   :  { %9 = vsyncpa [#allocation5], 0 }
   0x2   :  { %14 = vsyncadd [#allocation3], 768  ;;  %s1162_s12 = smov [#allocation2]   ;;  %s1114_s16 = scalar_lea.hbm %s1229_s0, 256 }
   0x3   :  { %s15_s13 = sshll.u32 %s1162_s12, 4  ;;  %p1115_p0 = scmp.ne.s32.totalorder %s1229_s0, %s1114_s16  ;;  %s16_s13 = int_to_ptr.vmem [resolvable:$true] %s15_s13 }
   0x4   :  { %p1118_p1 = scmp.lt.u32.totalorder %s1114_s16, %s1229_s0 }
   0x6   :  { %p1120_p2 = pnand %p1118_p1, %p1115_p0 }
   0x8   :  { %1123 = shalt.err (!%p1120_p2)
}
   0x9   :  { %s1124_s21 = scalar_lea.vmem %s16_s13, 256  ;;  %s1128_s22 = scalar_lea.vmem %s16_s13, 1024 }
   0xa   :  { %p1125_p3 = scmp.ne.s32.totalorder %s16_s13, %s1124_s21  ;;  %p1129_p4 = scmp.lt.s32.totalorder %s16_s13, %s16_s13 }
   0xb   :  { %p1130_p5 = scmp.lt.s32.totalorder %s1128_s22, %s1124_s21 }
   0xd   :  { %p1131_p6 = por %p1130_p5, %p1129_p4 }
   0xf   :  { %p1132_p7 = pnand %p1131_p6, %p1125_p3 }
  0x11   :  { %1135 = shalt.err (!%p1132_p7)
}
  0x12   :  { %s1163_s23 = smov 256   ;;  %s1164_s24 = smov 16  }
  0x13   :  { %21 = dma.hbm_to_vmem [thread:$0]  %s1229_s0, 256, %s16_s13, [#allocation3], %s1163_s23, %s1163_s23, %s1164_s24  }
  0x14   :  { %s1165_s27 = smov [#allocation4]   ;;  %s1136_s4 = scalar_lea.hbm %s1230_s1, 8192 }
  0x15   :  { %s27_s28 = sshll.u32 %s1165_s27, 4  ;;  %p1137_p8 = scmp.ne.s32.totalorder %s1230_s1, %s1136_s4  ;;  %s28_s28 = int_to_ptr.vmem [resolvable:$true] %s27_s28 }
  0x16   :  { %p1140_p9 = scmp.lt.u32.totalorder %s1136_s4, %s1230_s1 }
  0x18   :  { %p1142_p10 = pnand %p1140_p9, %p1137_p8 }
  0x1a   :  { %1145 = shalt.err (!%p1142_p10)
}
  0x1b   :  { %s1146_s9 = scalar_lea.vmem %s28_s28, 8192  ;;  %p1151_p12 = scmp.lt.s32.totalorder %s28_s28, %s28_s28 }
  0x1c   :  { %p1147_p11 = scmp.ne.s32.totalorder %s28_s28, %s1146_s9  ;;  %p1152_p13 = scmp.lt.s32.totalorder %s1146_s9, %s1146_s9 }
  0x1e   :  { %p1153_p0 = por %p1152_p13, %p1151_p12 }
  0x20   :  { %p1154_p1 = pnand %p1153_p0, %p1147_p11 }
  0x22   :  { %1157 = shalt.err (!%p1154_p1)
}
  0x23   :  { %s1166_s0 = smov 64   ;;  %s1167_s10 = smov 4  }
  0x24   :  { %33 = dma.hbm_to_vmem [thread:$0]  %s1230_s1, 8192, %s28_s28, [#allocation5], %s1166_s0, %s1166_s0, %s1167_s10  }
  0x25   :  { %1158 = dma.done.wait [#allocation3], 1024  }
  0x26   :  { %1159 = vsyncadd [#allocation3], 4294966272 }
  0x27   :  { %1160 = dma.done.wait [#allocation5], 8192  }
  0x28   :  { %1161 = vsyncadd [#allocation5], 4294959104  ;;  %v1034_v0 = vld [vmem:[#allocation4 + $0x40] sm:$0xff]   ;;  %v1038_v4 = vld [vmem:[#allocation4 + $0x48] sm:$0xff]   ;;  %v1168_v24 = vmov 1983009808   ;;  %v66_v26 = vlaneseq }
  0x29   :  { %v1035_v1 = vld [vmem:[#allocation4 + $0xc0] sm:$0xff]   ;;  %939 = vmatprep.subr.bf16.mxu0 %v1034_v0  ;;  %v1039_v5 = vld [vmem:[#allocation4 + $0xc8] sm:$0xff]   ;;  %v1042_v8 = vld [vmem:[#allocation4 + $0x50] sm:$0xff]   ;;  %v64_v25 = vunpack.c.l.s4 %v1168_v24  ;;  %vm831_vm0 = vcmask 7168  }
  0x2a   :  { %v1036_v2 = vld [vmem:[#allocation4] sm:$0xff]   ;;  %961 = vmatprep.subr.bf16.mxu1 %v1035_v1  ;;  %v1040_v6 = vld [vmem:[#allocation4 + $0x8] sm:$0xff]   ;;  %v1043_v9 = vld [vmem:[#allocation4 + $0xd0] sm:$0xff]   ;;  %v67_v32 = vshrl.u32 %v66_v26, 7 }
  0x2b   :  { %v1037_v3 = vld [vmem:[#allocation4 + $0x80] sm:$0xff]   ;;  %940 = vmatpush3.bf16.msra.mxu0 %v1036_v2  ;;  %v1041_v7 = vld [vmem:[#allocation4 + $0x88] sm:$0xff]   ;;  %v1044_v10 = vld [vmem:[#allocation4 + $0x10] sm:$0xff]   ;;  %v65_v31 = vunpack.c.0.s8 %v64_v25 }
  0x2c   :  { %962 = vmatpush3.bf16.msra.mxu1 %v1037_v3  ;;  %941 = vmatprep.subr.bf16.mxu0 %v1038_v4  ;;  %v1045_v11 = vld [vmem:[#allocation4 + $0x90] sm:$0xff]   ;;  %v1046_v12 = vld [vmem:[#allocation4 + $0x58] sm:$0xff]   ;;  %v1050_v16 = vld [vmem:[#allocation4 + $0x60] sm:$0xff]  }
  0x2d   :  { %963 = vmatprep.subr.bf16.mxu1 %v1039_v5  ;;  %v1047_v13 = vld [vmem:[#allocation4 + $0xd8] sm:$0xff]   ;;  %v1051_v17 = vld [vmem:[#allocation4 + $0xe0] sm:$0xff]   ;;  %v1054_v20 = vld [vmem:[#allocation4 + $0x68] sm:$0xff]   ;;  %v1213_v37 = vsub.s32 %v65_v31, %v67_v32 }
  0x2e   :  { %v1048_v14 = vld [vmem:[#allocation4 + $0x18] sm:$0xff]   ;;  %v1052_v18 = vld [vmem:[#allocation4 + $0x20] sm:$0xff]   ;;  %v1055_v21 = vld [vmem:[#allocation4 + $0xe8] sm:$0xff]  }
  0x2f   :  { %942 = vmatpush3.bf16.msra.mxu0 %v1040_v6  ;;  %v1049_v15 = vld [vmem:[#allocation4 + $0x98] sm:$0xff]   ;;  %v1053_v19 = vld [vmem:[#allocation4 + $0xa0] sm:$0xff]   ;;  %v1056_v22 = vld [vmem:[#allocation4 + $0x28] sm:$0xff]  }
  0x30   :  { %964 = vmatpush3.bf16.msra.mxu1 %v1041_v7  ;;  %943 = vmatprep.subr.bf16.mxu0 %v1042_v8  ;;  %v1057_v23 = vld [vmem:[#allocation4 + $0xa8] sm:$0xff]   ;;  %v1058_v27 = vld [vmem:[#allocation4 + $0x70] sm:$0xff]   ;;  %v1062_v33 = vld [vmem:[#allocation4 + $0x78] sm:$0xff]  }
  0x31   :  { %965 = vmatprep.subr.bf16.mxu1 %v1043_v9  ;;  %v1059_v28 = vld [vmem:[#allocation4 + $0xf0] sm:$0xff]   ;;  %v1063_v34 = vld [vmem:[#allocation4 + $0xf8] sm:$0xff]   ;;  %v1072_v44 = vld [vmem:[#allocation4 + $0x140] sm:$0xff]  }
  0x32   :  { %v1060_v29 = vld [vmem:[#allocation4 + $0x30] sm:$0xff]   ;;  %v1064_v35 = vld [vmem:[#allocation4 + $0x38] sm:$0xff]   ;;  %v1073_v47 = vld [vmem:[#allocation4 + $0x1c0] sm:$0xff]  }
  0x33   :  { %944 = vmatpush3.bf16.msra.mxu0 %v1044_v10  ;;  %v1061_v30 = vld [vmem:[#allocation4 + $0xb0] sm:$0xff]   ;;  %v1065_v36 = vld [vmem:[#allocation4 + $0xb8] sm:$0xff]   ;;  %v1074_v50 = vld [vmem:[#allocation4 + $0x100] sm:$0xff]  }
  0x34   :  { %966 = vmatpush3.bf16.msra.mxu1 %v1045_v11  ;;  %945 = vmatprep.subr.bf16.mxu0 %v1046_v12  ;;  %v1066_v38 = vld [vmem:[#allocation2] ss:$16 sps:$4 sm:$0xff]   ;;  %v1070_v40 = vld [vmem:[#allocation2 + $0x4] ss:$16 sps:$4 sm:$0xff]   ;;  %v1076_v56 = vld [vmem:[#allocation4 + $0x148] sm:$0xff]  }
  0x35   :  { %967 = vmatprep.subr.bf16.mxu1 %v1047_v13  ;;  %v1068_v39 = vld [vmem:[#allocation2 + $0x20] ss:$16 sps:$4 sm:$0xff]   ;;  %v1071_v41 = vld [vmem:[#allocation2 + $0x24] ss:$16 sps:$4 sm:$0xff]   ;;  %v69_v42 = vrot.slane %v1066_v38, %v1213_v37  ;;  %v76_v45 = vrot.slane %v1070_v40, %v1213_v37  ;;  %v1077_v59 = vld [vmem:[#allocation4 + $0x1c8] sm:$0xff]  }
  0x36   :  { %v83_v43 = vrot.slane %v1068_v39, %v1213_v37  ;;  %v90_v46 = vrot.slane %v1071_v41, %v1213_v37  ;;  %v1075_v53 = vld [vmem:[#allocation4 + $0x180] sm:$0xff]   ;;  %v1078_v60 = vld [vmem:[#allocation4 + $0x108] sm:$0xff]   ;;  %v1080_v62 = vld [vmem:[#allocation4 + $0x150] sm:$0xff]  }
  0x37   :  { %946 = vmatpush3.bf16.msra.mxu0 %v1048_v14  ;;  %v1079_v61 = vld [vmem:[#allocation4 + $0x188] sm:$0xff]   ;;  %v1081_v63 = vld [vmem:[#allocation4 + $0x1d0] sm:$0xff]   ;;  %v1084_v2 = vld [vmem:[#allocation4 + $0x158] sm:$0xff]  }
  0x38   :  { %968 = vmatpush3.bf16.msra.mxu1 %v1049_v15  ;;  %947 = vmatprep.subr.bf16.mxu0 %v1050_v16  ;;  %v92_v48 = vcombine.high %v69_v42, %v83_v43  ;;  %v91_v49 = vcombine.low %v69_v42, %v83_v43  ;;  %v94_v51 = vcombine.high %v76_v45, %v90_v46  ;;  %v1082_v0 = vld [vmem:[#allocation4 + $0x110] sm:$0xff]   ;;  %v1085_v3 = vld [vmem:[#allocation4 + $0x1d8] sm:$0xff]   ;;  %v1088_v6 = vld [vmem:[#allocation4 + $0x160] sm:$0xff]  }
  0x39   :  { %969 = vmatprep.subr.bf16.mxu1 %v1051_v17  ;;  %v93_v52 = vcombine.low %v76_v45, %v90_v46  ;;  %v1083_v1 = vld [vmem:[#allocation4 + $0x190] sm:$0xff]   ;;  %v1086_v4 = vld [vmem:[#allocation4 + $0x118] sm:$0xff]   ;;  %v1089_v7 = vld [vmem:[#allocation4 + $0x1e0] sm:$0xff]  }
  0x3a   :  { %v140_v54 = vpack.c.bf16 %v92_v48, %v92_v48  ;;  %v139_v55 = vpack.c.bf16 %v91_v49, %v91_v49  ;;  %v142_v57 = vpack.c.bf16 %v94_v51, %v94_v51  ;;  %v1087_v5 = vld [vmem:[#allocation4 + $0x198] sm:$0xff]   ;;  %v1090_v8 = vld [vmem:[#allocation4 + $0x120] sm:$0xff]   ;;  %v1092_v10 = vld [vmem:[#allocation4 + $0x168] sm:$0xff]  }
  0x3b   :  { %948 = vmatpush3.bf16.msra.mxu0 %v1052_v18  ;;  %v141_v58 = vpack.c.bf16 %v93_v52, %v93_v52  ;;  %v1091_v9 = vld [vmem:[#allocation4 + $0x1a0] sm:$0xff]   ;;  %v1093_v11 = vld [vmem:[#allocation4 + $0x1e8] sm:$0xff]   ;;  %v1096_v14 = vld [vmem:[#allocation4 + $0x170] sm:$0xff]  }
  0x3c   :  { %970 = vmatpush3.bf16.msra.mxu1 %v1053_v19  ;;  %949 = vmatprep.subr.bf16.mxu0 %v1054_v20  ;;  %v1094_v12 = vld [vmem:[#allocation4 + $0x128] sm:$0xff]   ;;  %v1097_v15 = vld [vmem:[#allocation4 + $0x1f0] sm:$0xff]   ;;  %v1100_v18 = vld [vmem:[#allocation4 + $0x178] sm:$0xff]  }
  0x3d   :  { %971 = vmatprep.subr.bf16.mxu1 %v1055_v21  ;;  %698 = vmatprep.mubr.bf16.mxu0 %v140_v54  ;;  %v1095_v13 = vld [vmem:[#allocation4 + $0x1a8] sm:$0xff]   ;;  %v1098_v16 = vld [vmem:[#allocation4 + $0x130] sm:$0xff]   ;;  %v1101_v19 = vld [vmem:[#allocation4 + $0x1f8] sm:$0xff]  }
  0x3e   :  { %738 = vmatprep.mubr.bf16.mxu1 %v142_v57  ;;  %v1099_v17 = vld [vmem:[#allocation4 + $0x1b0] sm:$0xff]   ;;  %v1102_v20 = vld [vmem:[#allocation4 + $0x138] sm:$0xff]   ;;  %v874_v41 = vld [vmem:[%s1231_s2] ss:$0 sm:$0xff] }
  0x3f   :  { %950 = vmatpush3.bf16.msra.mxu0 %v1056_v22  ;;  %v1103_v21 = vld [vmem:[#allocation4 + $0x1b8] sm:$0xff]  }
  0x40   :  { %972 = vmatpush3.bf16.msra.mxu1 %v1057_v23  ;;  %951 = vmatprep.subr.bf16.mxu0 %v1058_v27  ;;  %v1104_v22 = vld [vmem:[#allocation2 + $0x8] ss:$16 sps:$4 sm:$0xff]   ;;  %v1108_v24 = vld [vmem:[#allocation2 + $0xc] ss:$16 sps:$4 sm:$0xff]  }
  0x41   :  { %973 = vmatprep.subr.bf16.mxu1 %v1059_v28  ;;  %v1106_v23 = vld [vmem:[#allocation2 + $0x28] ss:$16 sps:$4 sm:$0xff]   ;;  %v1109_v25 = vld [vmem:[#allocation2 + $0x2c] ss:$16 sps:$4 sm:$0xff]   ;;  %v105_v26 = vrot.slane %v1104_v22, %v1213_v37  ;;  %v112_v28 = vrot.slane %v1108_v24, %v1213_v37 }
  0x42   :  { %v119_v27 = vrot.slane %v1106_v23, %v1213_v37 }
  0x43   :  { %952 = vmatpush3.bf16.msra.mxu0 %v1060_v29  ;;  %v126_v29 = vrot.slane %v1109_v25, %v1213_v37 }
  0x44   :  { %974 = vmatpush3.bf16.msra.mxu1 %v1061_v30  ;;  %953 = vmatprep.subr.bf16.mxu0 %v1062_v33  ;;  %v128_v30 = vcombine.high %v105_v26, %v119_v27  ;;  %v127_v31 = vcombine.low %v105_v26, %v119_v27 }
  0x45   :  { %975 = vmatprep.subr.bf16.mxu1 %v1063_v34  ;;  %v130_v32 = vcombine.high %v112_v28, %v126_v29  ;;  %v129_v33 = vcombine.low %v112_v28, %v126_v29 }
  0x46   :  { %v144_v34 = vpack.c.bf16 %v128_v30, %v128_v30 }
  0x47   :  { %954 = vmatpush3.bf16.msra.mxu0 %v1064_v35  ;;  %v143_v35 = vpack.c.bf16 %v127_v31, %v127_v31  ;;  %v145_v38 = vpack.c.bf16 %v129_v33, %v129_v33 }
  0x48   :  { %976 = vmatpush3.bf16.msra.mxu1 %v1065_v36  ;;  %983 = vmatprep.subr.bf16.mxu0 %v1072_v44  ;;  %v146_v36 = vpack.c.bf16 %v130_v32, %v130_v32 }
  0x49   :  { %1005 = vmatprep.subr.bf16.mxu1 %v1073_v47 }
  0x4a   :  { %699 = vmatmul.mubr.bf16.vlgmr.msra.gmra.mrb[0].mxu0 %v139_v55 }
  0x4b   :  { %739 = vmatmul.mubr.bf16.vlgmr.msra.gmra.mrb[0].mxu1 %v141_v58  ;;  %984 = vmatpush3.bf16.msra.mxu0 %v1074_v50 }
  0x4c   :  { %1006 = vmatpush3.bf16.msra.mxu1 %v1075_v53  ;;  %985 = vmatprep.subr.bf16.mxu0 %v1076_v56 }
  0x4d   :  { %1007 = vmatprep.subr.bf16.mxu1 %v1077_v59  ;;  %778 = vmatprep.mubr.bf16.mxu0 %v144_v34 }
  0x4e   :  { %818 = vmatprep.mubr.bf16.mxu1 %v146_v36 }
  0x4f   :  { %986 = vmatpush3.bf16.msra.mxu0 %v1078_v60 }
  0x50   :  { %1008 = vmatpush3.bf16.msra.mxu1 %v1079_v61  ;;  %987 = vmatprep.subr.bf16.mxu0 %v1080_v62 }
  0x51   :  { %1009 = vmatprep.subr.bf16.mxu1 %v1081_v63 }
  0x53   :  { %988 = vmatpush3.bf16.msra.mxu0 %v1082_v0 }
  0x54   :  { %1010 = vmatpush3.bf16.msra.mxu1 %v1083_v1  ;;  %989 = vmatprep.subr.bf16.mxu0 %v1084_v2 }
  0x55   :  { %1011 = vmatprep.subr.bf16.mxu1 %v1085_v3 }
  0x57   :  { %990 = vmatpush3.bf16.msra.mxu0 %v1086_v4 }
  0x58   :  { %1012 = vmatpush3.bf16.msra.mxu1 %v1087_v5  ;;  %991 = vmatprep.subr.bf16.mxu0 %v1088_v6 }
  0x59   :  { %1013 = vmatprep.subr.bf16.mxu1 %v1089_v7 }
  0x5b   :  { %992 = vmatpush3.bf16.msra.mxu0 %v1090_v8 }
  0x5c   :  { %1014 = vmatpush3.bf16.msra.mxu1 %v1091_v9  ;;  %993 = vmatprep.subr.bf16.mxu0 %v1092_v10 }
  0x5d   :  { %1015 = vmatprep.subr.bf16.mxu1 %v1093_v11 }
  0x5f   :  { %994 = vmatpush3.bf16.msra.mxu0 %v1094_v12 }
  0x60   :  { %1016 = vmatpush3.bf16.msra.mxu1 %v1095_v13  ;;  %995 = vmatprep.subr.bf16.mxu0 %v1096_v14 }
  0x61   :  { %1017 = vmatprep.subr.bf16.mxu1 %v1097_v15 }
  0x63   :  { %996 = vmatpush3.bf16.msra.mxu0 %v1098_v16 }
  0x64   :  { %1018 = vmatpush3.bf16.msra.mxu1 %v1099_v17  ;;  %997 = vmatprep.subr.bf16.mxu0 %v1100_v18 }
  0x65   :  { %1019 = vmatprep.subr.bf16.mxu1 %v1101_v19 }
  0x67   :  { %998 = vmatpush3.bf16.msra.mxu0 %v1102_v20 }
  0x68   :  { %1020 = vmatpush3.bf16.msra.mxu1 %v1103_v21 }
  0x6a   :  { %779 = vmatmul.mubr.bf16.vlgmr.msra.gmra.mrb[4].mxu0 %v143_v35 }
  0x6b   :  { %819 = vmatmul.mubr.bf16.vlgmr.msra.gmra.mrb[4].mxu1 %v145_v38 }
 0x11d   :  { %v955_v39 = vpop.f32.mrb[0].mxu0 }
 0x11e   :  { %v977_v40 = vpop.f32.mrb[0].mxu1  ;;  %v956_v37 = vpop.f32.mrb[1].mxu0 }
 0x11f   :  { %v957_v42 = vadd.f32 %v956_v37, %v955_v39  ;;  %v978_v43 = vpop.f32.mrb[1].mxu1  ;;  %v958_v44 = vpop.f32.mrb[2].mxu0 }
 0x120   :  { %v979_v45 = vadd.f32 %v978_v43, %v977_v40  ;;  %v980_v46 = vpop.f32.mrb[2].mxu1  ;;  %v959_v47 = vpop.f32.mrb[3].mxu0 }
 0x121   :  { %v701_v48 = vadd.f32 %v957_v42, %v874_v41  ;;  %v981_v49 = vpop.f32.mrb[3].mxu1 }
 0x123   :  { %v741_v50 = vadd.f32 %v979_v45, %v701_v48 }
 0x13d   :  { %v999_v51 = vpop.f32.mrb[4].mxu0 }
 0x13e   :  { %v1021_v52 = vpop.f32.mrb[4].mxu1  ;;  %v1000_v53 = vpop.f32.mrb[5].mxu0 }
 0x13f   :  { %v1001_v54 = vadd.f32 %v1000_v53, %v999_v51  ;;  %v1022_v55 = vpop.f32.mrb[5].mxu1  ;;  %v1002_v56 = vpop.f32.mrb[6].mxu0 }
 0x140   :  { %v1023_v57 = vadd.f32 %v1022_v55, %v1021_v52  ;;  %v1024_v58 = vpop.f32.mrb[6].mxu1  ;;  %v1003_v59 = vpop.f32.mrb[7].mxu0 }
 0x141   :  { %v781_v60 = vadd.f32 %v1001_v54, %v741_v50  ;;  %v1025_v61 = vpop.f32.mrb[7].mxu1 }
 0x143   :  { %v821_v62 = vadd.f32 %v1023_v57, %v781_v60 }
 0x145   :  { %v826_v63 = vsub.f32 0.0, %v821_v62 }
 0x147   :  { %v827_v0 = vmul.f32 1.442695, %v826_v63 }
 0x149   :  { %1110 = vpow2.f32 %v827_v0 }
 0x153   :  { %v1111_v1 = vpop.eup %1110 }
 0x154   :  { %v829_v2 = vadd.f32 1.0, %v1111_v1 }
 0x156   :  { %1112 = vrcp.f32 %v829_v2 }
 0x160   :  { %v1113_v3 = vpop.eup %1112 }
 0x161   :  { %832 = vst.msk [vmem:[#allocation6] sm:$0xff] %vm831_vm0, %v1113_v3 }
 0x168   :  { %v850_v4 = vld [vmem:[#allocation6] sm:$0x3] }
 0x169   :  { %851 = vst [vmem:[%s1232_s3] sm:$0x3] %v850_v4 }
 0x16a   :  { %868 = vsyncpa [#allocation3], 1 }
 0x16b   :  { %869 = vsyncpa [#allocation5], 1 }

</bundles_post_ra>
